<compile_context>
chip_gen: v5e
topology: v5e:2x2
jax: 0.10.0
libtpu: 0.0.40
codegen_flags: <defaults>
</compile_context>

<pallas_src>
import functools

import jax
import jax.numpy as jnp
from jax.experimental import pallas as pl
from jax.experimental.pallas import tpu as pltpu


def _multi_task_partial_kernel(
    crop_logits_ref, crop_tgt_ref,
    cls_logits_ref, cls_tgt_ref,
    det_p_ref, det_t_ref,
    ce_crop_out_ref, bce_out_ref, ce_cls_out_ref,
    *, batch_size, tile_b,
):
    pid = pl.program_id(0)
    row0 = pid * tile_b
    rows = row0 + jax.lax.broadcasted_iota(jnp.int32, (tile_b, 1), 0)
    valid = rows < batch_size                       # mask rows beyond the true batch

    def _ce_partial_sum(logits_ref, tgt_ref):
        # Sum over this tile of per-example CE = lse - z[target]; mean (/B) is applied
        # in the wrapper.  All math in f32 regardless of storage dtype.
        logits = logits_ref[...].astype(jnp.float32)
        tb, c = logits.shape
        m = jnp.max(logits, axis=-1, keepdims=True)
        z = logits - m
        lse = jnp.log(jnp.sum(jnp.exp(z), axis=-1, keepdims=True))          # (tb, 1)
        classes = jax.lax.broadcasted_iota(jnp.int32, (tb, c), 1)
        tgt = tgt_ref[...].astype(jnp.int32)                                 # (tb, 1)
        z_tgt = jnp.sum(jnp.where(classes == tgt, z, 0.0), axis=-1, keepdims=True)
        per_example = lse - z_tgt                                            # (tb, 1)
        return jnp.sum(jnp.where(valid, per_example, 0.0))

    ce_crop = _ce_partial_sum(crop_logits_ref, crop_tgt_ref)
    ce_cls = _ce_partial_sum(cls_logits_ref, cls_tgt_ref)

    # BCE on probabilities (model already applied sigmoid); logs clamped at -100 like
    # torch.nn.BCELoss.  Lane-dense block; padded slots were filled with p = t = 1 in
    # the wrapper so they contribute exactly 0.
    p = det_p_ref[...].astype(jnp.float32)
    t = det_t_ref[...].astype(jnp.float32)
    log_p = jnp.maximum(jnp.log(p), -100.0)
    log_1mp = jnp.maximum(jnp.log(1.0 - p), -100.0)
    bce = -jnp.sum(t * log_p + (1.0 - t) * log_1mp)

    ce_crop_out_ref[...] = ce_crop.reshape(1, 1, 1)
    bce_out_ref[...] = bce.reshape(1, 1, 1)
    ce_cls_out_ref[...] = ce_cls.reshape(1, 1, 1)


def multi_task_loss(
    crop_pred, crop_target,
    disease_detection_pred, disease_detection_target,
    disease_classification_pred, disease_classification_target,
    weight_crop=1.0, weight_disease_detection=1.0, weight_disease_classification=1.0,
):
    """Pallas equivalent of MultiTaskLoss.forward. Returns a scalar float32."""
    B, C_crop = crop_pred.shape
    C_dis = disease_classification_pred.shape[1]

    # Batch tile: a multiple of 128 lanes; 1024 (= 8 sublanes x 128 lanes) once the batch
    # is large enough so the lane-dense BCE block is a full (8, 128) tile per grid step.
    tile_b = min(1024, ((B + 127) // 128) * 128)
    num_tiles = (B + tile_b - 1) // tile_b
    b_pad = num_tiles * tile_b

    # Class targets as (B, 1) int32 (no padding; OOB rows of the last tile are masked
    # inside the kernel).
    crop_tgt = crop_target.reshape(B, 1)
    cls_tgt = disease_classification_target.reshape(B, 1)
    if crop_tgt.dtype != jnp.int32:
        crop_tgt = crop_tgt.astype(jnp.int32)
    if cls_tgt.dtype != jnp.int32:
        cls_tgt = cls_tgt.astype(jnp.int32)

    # BCE operands: lane-dense (b_pad // 128, 128); pad with p = t = 1 -> contributes 0.
    det_p = disease_detection_pred.reshape(-1)
    det_t = disease_detection_target.reshape(-1)
    if b_pad != B:
        det_p = jnp.pad(det_p, (0, b_pad - B), constant_values=1.0)
        det_t = jnp.pad(det_t, (0, b_pad - B), constant_values=1.0)
    det_p = det_p.reshape(b_pad // 128, 128)
    det_t = det_t.reshape(b_pad // 128, 128)

    kernel = functools.partial(_multi_task_partial_kernel, batch_size=B, tile_b=tile_b)

    def _nbytes(x):
        return x.size * x.dtype.itemsize

    cost = pl.CostEstimate(
        flops=int(6 * B * (C_crop + C_dis) + 8 * B),
        transcendentals=int(B * (C_crop + C_dis) + 4 * B),
        bytes_accessed=int(
            _nbytes(crop_pred) + _nbytes(disease_classification_pred)
            + _nbytes(crop_tgt) + _nbytes(cls_tgt)
            + _nbytes(det_p) + _nbytes(det_t) + 3 * num_tiles * 4
        ),
    )

    partial_shape = jax.ShapeDtypeStruct((num_tiles, 1, 1), jnp.float32)
    partial_spec = pl.BlockSpec((1, 1, 1), lambda i: (i, 0, 0))

    ce_crop_p, bce_p, ce_cls_p = pl.pallas_call(
        kernel,
        grid=(num_tiles,),
        in_specs=[
            pl.BlockSpec((tile_b, C_crop), lambda i: (i, 0)),        # crop logits
            pl.BlockSpec((tile_b, 1), lambda i: (i, 0)),             # crop targets
            pl.BlockSpec((tile_b, C_dis), lambda i: (i, 0)),         # disease logits
            pl.BlockSpec((tile_b, 1), lambda i: (i, 0)),             # disease targets
            pl.BlockSpec((tile_b // 128, 128), lambda i: (i, 0)),    # detection probs
            pl.BlockSpec((tile_b // 128, 128), lambda i: (i, 0)),    # detection targets
        ],
        out_specs=[partial_spec, partial_spec, partial_spec],
        out_shape=[partial_shape, partial_shape, partial_shape],
        compiler_params=pltpu.CompilerParams(
            dimension_semantics=("parallel",),
            vmem_limit_bytes=32 * 1024 * 1024,
        ),
        cost_estimate=cost,
    )(crop_pred, crop_tgt, disease_classification_pred, cls_tgt, det_p, det_t)

    # Tiny finalize in XLA: sum per-tile partials, mean by the true B, apply weights.
    # Weights never enter the kernel, so changing them costs nothing (no recompile).
    inv_b = 1.0 / float(B)
    loss_crop = jnp.sum(ce_crop_p) * inv_b
    loss_det = jnp.sum(bce_p) * inv_b
    loss_cls = jnp.sum(ce_cls_p) * inv_b
    return (weight_crop * loss_crop
            + weight_disease_detection * loss_det
            + weight_disease_classification * loss_cls)


def _reference(crop_pred, crop_tgt, det_pred, det_tgt, cls_pred, cls_tgt,
               w_crop=1.0, w_det=1.0, w_cls=1.0):
    """Pure-JAX reference (matches torch CrossEntropyLoss / BCELoss, mean reduction)."""
    def ce(logits, tgt):
        logp = jax.nn.log_softmax(logits.astype(jnp.float32), axis=-1)
        return -jnp.mean(jnp.take_along_axis(logp, tgt[:, None], axis=-1))
    p = det_pred.reshape(-1).astype(jnp.float32)
    t = det_tgt.reshape(-1).astype(jnp.float32)
    bce = -jnp.mean(t * jnp.maximum(jnp.log(p), -100.0)
                    + (1.0 - t) * jnp.maximum(jnp.log(1.0 - p), -100.0))
    return w_crop * ce(crop_pred, crop_tgt) + w_det * bce + w_cls * ce(cls_pred, cls_tgt)


if __name__ == "__main__":
    key = jax.random.PRNGKey(0)
    k1, k2, k3, k4, k5, k6 = jax.random.split(key, 6)

    B = 8            # batch
    C_CROP = 8       # number of crop classes
    C_DISEASE = 16   # number of disease classes

    crop_pred = jax.random.normal(k1, (B, C_CROP), dtype=jnp.float32)
    crop_target = jax.random.randint(k2, (B,), 0, C_CROP, dtype=jnp.int32)

    # disease_detection_pred is a probability (model ends in sigmoid); shape (B, 1).
    disease_detection_pred = jax.nn.sigmoid(jax.random.normal(k3, (B, 1), dtype=jnp.float32))
    disease_detection_target = jax.random.bernoulli(k4, 0.5, (B,)).astype(jnp.float32)

    disease_classification_pred = jax.random.normal(k5, (B, C_DISEASE), dtype=jnp.float32)
    disease_classification_target = jax.random.randint(k6, (B,), 0, C_DISEASE, dtype=jnp.int32)

    total = multi_task_loss(
        crop_pred, crop_target,
        disease_detection_pred, disease_detection_target,
        disease_classification_pred, disease_classification_target,
        weight_crop=1.0, weight_disease_detection=1.0, weight_disease_classification=1.0,
    )
    total = jax.block_until_ready(total)

    ref = _reference(
        crop_pred, crop_target,
        disease_detection_pred, disease_detection_target,
        disease_classification_pred, disease_classification_target,
    )
    assert jnp.allclose(total, ref, rtol=1e-5, atol=1e-5), (total, ref)

    print("KERNEL_OK")
</pallas_src>

<mosaic_0001>
module attributes {stable_mosaic.version = 11 : i64} {
  func.func @_multi_task_partial_kernel(%arg0: i32, %arg1: memref<128x8xf32, #tpu.memory_space<vmem>>, %arg2: memref<128x1xi32, #tpu.memory_space<vmem>>, %arg3: memref<128x16xf32, #tpu.memory_space<vmem>>, %arg4: memref<128x1xi32, #tpu.memory_space<vmem>>, %arg5: memref<1x128xf32, #tpu.memory_space<vmem>>, %arg6: memref<1x128xf32, #tpu.memory_space<vmem>>, %arg7: memref<1x1x1xf32, #tpu.memory_space<vmem>>, %arg8: memref<1x1x1xf32, #tpu.memory_space<vmem>>, %arg9: memref<1x1x1xf32, #tpu.memory_space<vmem>>) attributes {dimension_semantics = [#tpu.dimension_semantics<parallel>], iteration_bounds = array<i64: 1>, scalar_prefetch = 0 : i64, scratch_operands = 0 : i64, tpu.core_type = #tpu.core_type<tc>, window_params = [{transform_indices = @transform_0, window_bounds = array<i64: 128, 8>}, {transform_indices = @transform_1, window_bounds = array<i64: 128, 1>}, {transform_indices = @transform_2, window_bounds = array<i64: 128, 16>}, {transform_indices = @transform_3, window_bounds = array<i64: 128, 1>}, {transform_indices = @transform_4, window_bounds = array<i64: 1, 128>}, {transform_indices = @transform_5, window_bounds = array<i64: 1, 128>}, {transform_indices = @transform_6, window_bounds = array<i64: 1, 1, 1>}, {transform_indices = @transform_7, window_bounds = array<i64: 1, 1, 1>}, {transform_indices = @transform_8, window_bounds = array<i64: 1, 1, 1>}]} {
    %c128_i32 = arith.constant 128 : i32
    %0 = arith.muli %arg0, %c128_i32 : i32
    %1 = tpu.iota {dimensions = array<i32: 0>} : vector<128x1xi32>
    %2 = vector.broadcast %0 : i32 to vector<128x1xi32>
    %3 = arith.addi %2, %1 : vector<128x1xi32>
    %c8_i32 = arith.constant 8 : i32
    %4 = vector.broadcast %c8_i32 : i32 to vector<128x1xi32>
    %5 = arith.cmpi slt, %3, %4 : vector<128x1xi32>
    %c0 = arith.constant 0 : index
    %c0_0 = arith.constant 0 : index
    %6 = vector.load %arg1[%c0, %c0_0] : memref<128x8xf32, #tpu.memory_space<vmem>>, vector<128x8xf32>
    %cst = arith.constant dense<0xFF800000> : vector<128xf32>
    %7 = vector.multi_reduction <maximumf>, %6, %cst [1] : vector<128x8xf32> to vector<128xf32>
    %8 = vector.shape_cast %7 : vector<128xf32> to vector<128x1xf32>
    %9 = vector.broadcast %8 : vector<128x1xf32> to vector<128x8xf32>
    %10 = arith.subf %6, %9 : vector<128x8xf32>
    %11 = math.exp %10 : vector<128x8xf32>
    %cst_1 = arith.constant dense<0.000000e+00> : vector<128xf32>
    %12 = vector.multi_reduction <add>, %11, %cst_1 [1] : vector<128x8xf32> to vector<128xf32>
    %13 = vector.shape_cast %12 : vector<128xf32> to vector<128x1xf32>
    %14 = math.log %13 : vector<128x1xf32>
    %15 = tpu.iota {dimensions = array<i32: 1>} : vector<128x8xi32>
    %c0_2 = arith.constant 0 : index
    %c0_3 = arith.constant 0 : index
    %16 = vector.load %arg2[%c0_2, %c0_3] : memref<128x1xi32, #tpu.memory_space<vmem>>, vector<128x1xi32>
    %17 = vector.broadcast %16 : vector<128x1xi32> to vector<128x8xi32>
    %18 = arith.cmpi eq, %15, %17 : vector<128x8xi32>
    %cst_4 = arith.constant 0.000000e+00 : f32
    %19 = vector.broadcast %cst_4 : f32 to vector<128x8xf32>
    %20 = arith.select %18, %10, %19 : vector<128x8xi1>, vector<128x8xf32>
    %cst_5 = arith.constant dense<0.000000e+00> : vector<128xf32>
    %21 = vector.multi_reduction <add>, %20, %cst_5 [1] : vector<128x8xf32> to vector<128xf32>
    %22 = vector.shape_cast %21 : vector<128xf32> to vector<128x1xf32>
    %23 = arith.subf %14, %22 : vector<128x1xf32>
    %cst_6 = arith.constant 0.000000e+00 : f32
    %24 = vector.broadcast %cst_6 : f32 to vector<128x1xf32>
    %25 = arith.select %5, %23, %24 : vector<128x1xi1>, vector<128x1xf32>
    %26 = vector.shape_cast %25 : vector<128x1xf32> to vector<1x128x1xf32>
    %cst_7 = arith.constant dense<0.000000e+00> : vector<1xf32>
    %27 = vector.multi_reduction <add>, %26, %cst_7 [1, 2] : vector<1x128x1xf32> to vector<1xf32>
    %28 = vector.shape_cast %27 : vector<1xf32> to vector<1x1x1xf32>
    %29 = vector.extract %28[0, 0, 0] : f32 from vector<1x1x1xf32>
    %c0_8 = arith.constant 0 : index
    %c0_9 = arith.constant 0 : index
    %30 = vector.load %arg3[%c0_8, %c0_9] : memref<128x16xf32, #tpu.memory_space<vmem>>, vector<128x16xf32>
    %cst_10 = arith.constant dense<0xFF800000> : vector<128xf32>
    %31 = vector.multi_reduction <maximumf>, %30, %cst_10 [1] : vector<128x16xf32> to vector<128xf32>
    %32 = vector.shape_cast %31 : vector<128xf32> to vector<128x1xf32>
    %33 = vector.broadcast %32 : vector<128x1xf32> to vector<128x16xf32>
    %34 = arith.subf %30, %33 : vector<128x16xf32>
    %35 = math.exp %34 : vector<128x16xf32>
    %cst_11 = arith.constant dense<0.000000e+00> : vector<128xf32>
    %36 = vector.multi_reduction <add>, %35, %cst_11 [1] : vector<128x16xf32> to vector<128xf32>
    %37 = vector.shape_cast %36 : vector<128xf32> to vector<128x1xf32>
    %38 = math.log %37 : vector<128x1xf32>
    %39 = tpu.iota {dimensions = array<i32: 1>} : vector<128x16xi32>
    %c0_12 = arith.constant 0 : index
    %c0_13 = arith.constant 0 : index
    %40 = vector.load %arg4[%c0_12, %c0_13] : memref<128x1xi32, #tpu.memory_space<vmem>>, vector<128x1xi32>
    %41 = vector.broadcast %40 : vector<128x1xi32> to vector<128x16xi32>
    %42 = arith.cmpi eq, %39, %41 : vector<128x16xi32>
    %cst_14 = arith.constant 0.000000e+00 : f32
    %43 = vector.broadcast %cst_14 : f32 to vector<128x16xf32>
    %44 = arith.select %42, %34, %43 : vector<128x16xi1>, vector<128x16xf32>
    %cst_15 = arith.constant dense<0.000000e+00> : vector<128xf32>
    %45 = vector.multi_reduction <add>, %44, %cst_15 [1] : vector<128x16xf32> to vector<128xf32>
    %46 = vector.shape_cast %45 : vector<128xf32> to vector<128x1xf32>
    %47 = arith.subf %38, %46 : vector<128x1xf32>
    %cst_16 = arith.constant 0.000000e+00 : f32
    %48 = vector.broadcast %cst_16 : f32 to vector<128x1xf32>
    %49 = arith.select %5, %47, %48 : vector<128x1xi1>, vector<128x1xf32>
    %50 = vector.shape_cast %49 : vector<128x1xf32> to vector<1x128x1xf32>
    %cst_17 = arith.constant dense<0.000000e+00> : vector<1xf32>
    %51 = vector.multi_reduction <add>, %50, %cst_17 [1, 2] : vector<1x128x1xf32> to vector<1xf32>
    %52 = vector.shape_cast %51 : vector<1xf32> to vector<1x1x1xf32>
    %53 = vector.extract %52[0, 0, 0] : f32 from vector<1x1x1xf32>
    %c0_18 = arith.constant 0 : index
    %c0_19 = arith.constant 0 : index
    %54 = vector.load %arg5[%c0_18, %c0_19] : memref<1x128xf32, #tpu.memory_space<vmem>>, vector<1x128xf32>
    %c0_20 = arith.constant 0 : index
    %c0_21 = arith.constant 0 : index
    %55 = vector.load %arg6[%c0_20, %c0_21] : memref<1x128xf32, #tpu.memory_space<vmem>>, vector<1x128xf32>
    %56 = math.log %54 : vector<1x128xf32>
    %cst_22 = arith.constant -1.000000e+02 : f32
    %57 = vector.broadcast %cst_22 : f32 to vector<1x128xf32>
    %58 = arith.maximumf %56, %57 : vector<1x128xf32>
    %cst_23 = arith.constant 1.000000e+00 : f32
    %59 = vector.broadcast %cst_23 : f32 to vector<1x128xf32>
    %60 = arith.subf %59, %54 : vector<1x128xf32>
    %61 = math.log %60 : vector<1x128xf32>
    %cst_24 = arith.constant -1.000000e+02 : f32
    %62 = vector.broadcast %cst_24 : f32 to vector<1x128xf32>
    %63 = arith.maximumf %61, %62 : vector<1x128xf32>
    %64 = arith.mulf %55, %58 : vector<1x128xf32>
    %cst_25 = arith.constant 1.000000e+00 : f32
    %65 = vector.broadcast %cst_25 : f32 to vector<1x128xf32>
    %66 = arith.subf %65, %55 : vector<1x128xf32>
    %67 = arith.mulf %66, %63 : vector<1x128xf32>
    %68 = arith.addf %64, %67 : vector<1x128xf32>
    %69 = vector.shape_cast %68 : vector<1x128xf32> to vector<1x1x128xf32>
    %cst_26 = arith.constant dense<0.000000e+00> : vector<1xf32>
    %70 = vector.multi_reduction <add>, %69, %cst_26 [1, 2] : vector<1x1x128xf32> to vector<1xf32>
    %71 = vector.shape_cast %70 : vector<1xf32> to vector<1x1x1xf32>
    %72 = vector.extract %71[0, 0, 0] : f32 from vector<1x1x1xf32>
    %cst_27 = arith.constant 0.000000e+00 : f32
    %73 = arith.subf %cst_27, %72 : f32
    %74 = vector.broadcast %29 : f32 to vector<1x1x1xf32>
    %c0_28 = arith.constant 0 : index
    %c0_29 = arith.constant 0 : index
    %c0_30 = arith.constant 0 : index
    %75 = vector.load %arg7[%c0_28, %c0_29, %c0_30] : memref<1x1x1xf32, #tpu.memory_space<vmem>>, vector<1x1x1xf32>
    tpu.vector_store %arg7[%c0_28, %c0_29, %c0_30], %74 {strides = array<i32>} : memref<1x1x1xf32, #tpu.memory_space<vmem>>, vector<1x1x1xf32>,
    %76 = vector.broadcast %73 : f32 to vector<1x1x1xf32>
    %c0_31 = arith.constant 0 : index
    %c0_32 = arith.constant 0 : index
    %c0_33 = arith.constant 0 : index
    %77 = vector.load %arg8[%c0_31, %c0_32, %c0_33] : memref<1x1x1xf32, #tpu.memory_space<vmem>>, vector<1x1x1xf32>
    tpu.vector_store %arg8[%c0_31, %c0_32, %c0_33], %76 {strides = array<i32>} : memref<1x1x1xf32, #tpu.memory_space<vmem>>, vector<1x1x1xf32>,
    %78 = vector.broadcast %53 : f32 to vector<1x1x1xf32>
    %c0_34 = arith.constant 0 : index
    %c0_35 = arith.constant 0 : index
    %c0_36 = arith.constant 0 : index
    %79 = vector.load %arg9[%c0_34, %c0_35, %c0_36] : memref<1x1x1xf32, #tpu.memory_space<vmem>>, vector<1x1x1xf32>
    tpu.vector_store %arg9[%c0_34, %c0_35, %c0_36], %78 {strides = array<i32>} : memref<1x1x1xf32, #tpu.memory_space<vmem>>, vector<1x1x1xf32>,
    return
  }
  func.func @transform_0(%arg0: i32) -> (i32, i32) {
    %c0_i32 = arith.constant 0 : i32
    %c0_i32_0 = arith.constant 0 : i32
    return %arg0, %c0_i32 : i32, i32
  }
  func.func @transform_1(%arg0: i32) -> (i32, i32) {
    %c0_i32 = arith.constant 0 : i32
    %c0_i32_0 = arith.constant 0 : i32
    return %arg0, %c0_i32 : i32, i32
  }
  func.func @transform_2(%arg0: i32) -> (i32, i32) {
    %c0_i32 = arith.constant 0 : i32
    %c0_i32_0 = arith.constant 0 : i32
    return %arg0, %c0_i32 : i32, i32
  }
  func.func @transform_3(%arg0: i32) -> (i32, i32) {
    %c0_i32 = arith.constant 0 : i32
    %c0_i32_0 = arith.constant 0 : i32
    return %arg0, %c0_i32 : i32, i32
  }
  func.func @transform_4(%arg0: i32) -> (i32, i32) {
    %c0_i32 = arith.constant 0 : i32
    %c0_i32_0 = arith.constant 0 : i32
    return %arg0, %c0_i32 : i32, i32
  }
  func.func @transform_5(%arg0: i32) -> (i32, i32) {
    %c0_i32 = arith.constant 0 : i32
    %c0_i32_0 = arith.constant 0 : i32
    return %arg0, %c0_i32 : i32, i32
  }
  func.func @transform_6(%arg0: i32) -> (i32, i32, i32) {
    %c0_i32 = arith.constant 0 : i32
    %c0_i32_0 = arith.constant 0 : i32
    %c0_i32_1 = arith.constant 0 : i32
    return %arg0, %c0_i32, %c0_i32_0 : i32, i32, i32
  }
  func.func @transform_7(%arg0: i32) -> (i32, i32, i32) {
    %c0_i32 = arith.constant 0 : i32
    %c0_i32_0 = arith.constant 0 : i32
    %c0_i32_1 = arith.constant 0 : i32
    return %arg0, %c0_i32, %c0_i32_0 : i32, i32, i32
  }
  func.func @transform_8(%arg0: i32) -> (i32, i32, i32) {
    %c0_i32 = arith.constant 0 : i32
    %c0_i32_0 = arith.constant 0 : i32
    %c0_i32_1 = arith.constant 0 : i32
    return %arg0, %c0_i32, %c0_i32_0 : i32, i32, i32
  }
}

</mosaic_0001>

<bundles_post_ra>
// kernel: tpu_custom_call.1
= control target key start
LH: loop header
LB: loop body
LE: loop exit
PB: predicated region body
PF: predicated region fallthrough
CT: control target
= control target key end

     0   :  { %14 = vsyncpa [#allocation3], 0  ;;  %vm95_vm0 = vcmask 64512   ;;  %v1079_v3 = vmov 0   ;;  %s1164_s0 = inlined_call_operand.vmem [shape: f32[8,8], index: 0, kind: input, shape index: {}]   ;;  %s1165_s1 = inlined_call_operand.vmem [shape: s32[8,1], index: 1, kind: input, shape index: {}]   ;;  %s1166_s2 = inlined_call_operand.vmem [shape: f32[8,16], index: 2, kind: input, shape index: {}]   ;;  %s1167_s3 = inlined_call_operand.vmem [shape: s32[8,1], index: 3, kind: input, shape index: {}]   ;;  %s1168_s4 = inlined_call_operand.vmem [shape: f32[1,128], index: 4, kind: input, shape index: {}]   ;;  %s1169_s5 = inlined_call_operand.vmem [shape: f32[1,128], index: 5, kind: input, shape index: {}]   ;;  %s1170_s6 = inlined_call_operand.hbm [shape: f32[1,1,1], index: 6, kind: output, shape index: {0}]   ;;  %s1171_s7 = inlined_call_operand.hbm [shape: f32[1,1,1], index: 7, kind: output, shape index: {1}]   ;;  %s1172_s8 = inlined_call_operand.hbm [shape: f32[1,1,1], index: 8, kind: output, shape index: {2}]  }
   0x1   :  { %v79_v0 = vld [vmem:[%s1164_s0] sm:$0xff]  ;;  %989 = vset.pattern.permute.xlu1 %v1079_v3 }
   0x2   :  { %v274_v1 = vld [vmem:[%s1165_s1] sm:$0xff]  ;;  %v96_v2 = vsel %vm95_vm0, %v79_v0, -inf }
   0x3   :  { %15 = vsyncpa [#allocation5], 0  ;;  %990 = vset.pattern.permute.xlu0 %v1079_v3  ;;  %291 = vperm.xlu1 %989, %v274_v1   ;;  %v491_v4 = vld [vmem:[%s1166_s2] sm:$0xff]  ;;  %vm507_vm1 = vcmask 130048   ;;  %v272_v7 = vlaneseq  ;;  %vm450_vm4 = vcmask 7168   ;;  %vm913_vm5 = vcmask 1040384  }
   0x4   :  { %97 = vmax.xlane.f32.xlu0 %v96_v2  ;;  %v508_v5 = vsel %vm507_vm1, %v491_v4, -inf  ;;  %v684_v6 = vld [vmem:[%s1167_s3] sm:$0xff]  ;;  %s939_s13 = sshll.u32 %s1170_s6, 4  ;;  %s1080_s14 = smov [#allocation2]   ;;  %vm926_vm6 = vcmask 0   ;;  %s940_s13 = int_to_ptr.hbm [resolvable:$true] %s939_s13 }
   0x5   :  { %v273_v8 = vand.u32 127, %v272_v7  ;;  %v900_v25 = vld [vmem:[%s1168_s4] sm:$0x1]  ;;  %s937_s15 = sshll.u32 %s1080_s14, 4  ;;  %s1081_s17 = smov [#allocation4]   ;;  %s938_s15 = int_to_ptr.vmem [resolvable:$true] %s937_s15 }
   0x6   :  { %v905_v26 = vsub.f32 1.0, %v900_v25  ;;  %v901_v32 = vld [vmem:[%s1169_s5] sm:$0x1]  ;;  %s948_s18 = sshll.u32 %s1081_s17, 4  ;;  %s950_s21 = sshll.u32 %s1171_s7, 4  ;;  %s949_s18 = int_to_ptr.vmem [resolvable:$true] %s948_s18  ;;  %s951_s21 = int_to_ptr.hbm [resolvable:$true] %s950_s21 }
   0x7   :  { %v910_v35 = vsub.f32 1.0, %v901_v32  ;;  %s1082_s23 = smov [#allocation6]   ;;  %s961_s27 = sshll.u32 %s1172_s8, 4  ;;  %s962_s27 = int_to_ptr.hbm [resolvable:$true] %s961_s27 }
   0x8   :  { %s959_s24 = sshll.u32 %s1082_s23, 4  ;;  %s960_s24 = int_to_ptr.vmem [resolvable:$true] %s959_s24 }
   0xb   :  { %701 = vperm.xlu1 %989, %v684_v6  }
   0xc   :  { %509 = vmax.xlane.f32.xlu0 %v508_v5 }
  0x75   :  { %v292_v9 = vpop.permute.xlu1 %291 }
  0x76   :  { %vm338_vm2 = vcmp.eq.s32.totalorder %v273_v8, %v292_v9 }
  0x77   :  { %v98_v10 = vpop.xlane.xlu0 %97 }
  0x78   :  { %v144_v11 = vsub.f32 %v79_v0, %v98_v10 }
  0x7a   :  { %v160_v12 = vmul.f32 1.442695, %v144_v11  ;;  %v354_v13 = vsel %vm338_vm2, %v144_v11, 0.0 }
  0x7b   :  { %v370_v14 = vsel %vm95_vm0, %v354_v13, 0.0 }
  0x7c   :  { %991 = vpow2.f32 %v160_v12  ;;  %371 = vadd.xlane.f32.xlu0 %v370_v14 }
  0x7d   :  { %v702_v15 = vpop.permute.xlu1 %701 }
  0x7e   :  { %vm748_vm3 = vcmp.eq.s32.totalorder %v273_v8, %v702_v15 }
  0x7f   :  { %v510_v16 = vpop.xlane.xlu0 %509 }
  0x80   :  { %v556_v17 = vsub.f32 %v491_v4, %v510_v16 }
  0x82   :  { %v992_v18 = vpop.eup %991  ;;  %v572_v19 = vmul.f32 1.442695, %v556_v17  ;;  %v764_v20 = vsel %vm748_vm3, %v556_v17, 0.0 }
  0x83   :  { %v192_v21 = vsel %vm95_vm0, %v992_v18, 0.0  ;;  %v780_v22 = vsel %vm507_vm1, %v764_v20, 0.0 }
  0x84   :  { %993 = vpow2.f32 %v572_v19  ;;  %193 = vadd.xlane.f32.xlu2 %v192_v21  ;;  %781 = vadd.xlane.f32.xlu1 %v780_v22 }
  0x85   :  { %995 = vlog2.f32 %v900_v25 }
  0x86   :  { %997 = vlog2.f32 %v905_v26 }
  0x8a   :  { %v994_v23 = vpop.eup %993 }
  0x8b   :  { %v604_v24 = vsel %vm507_vm1, %v994_v23, 0.0  ;;  %v996_v27 = vpop.eup %995 }
  0x8c   :  { %605 = vadd.xlane.f32.xlu2 %v604_v24  ;;  %v998_v28 = vpop.eup %997  ;;  %v903_v30 = vmul.f32 0.6931472, %v996_v27 }
  0x8d   :  { %v907_v31 = vmul.f32 0.6931472, %v998_v28 }
  0x8e   :  { %v904_v33 = vmax.f32 %v903_v30, -100.0 }
  0x8f   :  { %v908_v34 = vmax.f32 %v907_v31, -100.0 }
  0x90   :  { %v909_v41 = vmul.f32 %v904_v33, %v901_v32 }
  0x91   :  { %v911_v42 = vmul.f32 %v910_v35, %v908_v34 }
  0x93   :  { %v912_v44 = vadd.f32 %v911_v42, %v909_v41 }
  0x95   :  { %v914_v49 = vsel %vm913_vm5, %v912_v44, 0.0 }
  0xef   :  { %v372_v39 = vpop.xlane.xlu0 %371 }
  0xf7   :  { %v194_v29 = vpop.xlane.xlu2 %193  ;;  %v782_v47 = vpop.xlane.xlu1 %781 }
  0xf8   :  { %999 = vlog2.f32 %v194_v29 }
  0xfe   :  { %v1000_v36 = vpop.eup %999 }
  0xff   :  { %v241_v37 = vmul.f32 0.6931472, %v1000_v36  ;;  %v606_v38 = vpop.xlane.xlu2 %605 }
 0x100   :  { %1001 = vlog2.f32 %v606_v38 }
 0x101   :  { %v418_v40 = vsub.f32 %v241_v37, %v372_v39 }
 0x103   :  { %v451_v43 = vsel %vm450_vm4, %v418_v40, 0.0 }
 0x104   :  { %482 = vadd.xlane.f32.xlu2 %v451_v43 }
 0x106   :  { %v1002_v45 = vpop.eup %1001 }
 0x107   :  { %v653_v46 = vmul.f32 0.6931472, %v1002_v45 }
 0x109   :  { %v828_v48 = vsub.f32 %v653_v46, %v782_v47 }
 0x10b   :  { %v860_v50 = vsel %vm450_vm4, %v828_v48, 0.0 }
 0x10c   :  { %891 = vadd.xlane.f32.xlu0 %v860_v50  ;;  %915 = vadd.xlane.f32.xlu2 %v914_v49 }
 0x177   :  { %v483_v51 = vpop.xlane.xlu2 %482 }
 0x178   :  { %v484_v52 = vrot.slane %v483_v51, 4 }
 0x17a   :  { %v485_v53 = vadd.f32 %v484_v52, %v483_v51 }
 0x17c   :  { %v486_v54 = vrot.slane %v485_v53, 2 }
 0x17e   :  { %v487_v55 = vadd.f32 %v486_v54, %v485_v53 }
 0x17f   :  { %v916_v56 = vpop.xlane.xlu2 %915  ;;  %v892_v57 = vpop.xlane.xlu0 %891 }
 0x180   :  { %v917_v58 = vrot.slane %v916_v56, 4  ;;  %v893_v59 = vrot.slane %v892_v57, 4  ;;  %v488_v60 = vrot.slane %v487_v55, 1 }
 0x182   :  { %v918_v61 = vadd.f32 %v917_v58, %v916_v56  ;;  %v894_v62 = vadd.f32 %v893_v59, %v892_v57  ;;  %v489_v63 = vadd.f32 %v488_v60, %v487_v55 }
 0x184   :  { %v919_v0 = vrot.slane %v918_v61, 2  ;;  %v895_v1 = vrot.slane %v894_v62, 2  ;;  %979 = vpush %v489_v63 }
 0x186   :  { %v920_v2 = vadd.f32 %v919_v0, %v918_v61  ;;  %v896_v3 = vadd.f32 %v895_v1, %v894_v62 }
 0x188   :  { %v897_v4 = vrot.slane %v896_v3, 1  ;;  %v921_v5 = vrot.slane %v920_v2, 1 }
 0x18a   :  { %v898_v6 = vadd.f32 %v897_v4, %v896_v3  ;;  %v922_v7 = vadd.f32 %v921_v5, %v920_v2 }
 0x18c   :  { %981 = vpush %v898_v6 }
 0x18d   :  { %983 = vpush %v922_v7 }
 0x1b5   :  { %s980_s16 = spop %979 }
 0x1b6   :  { %v925_v8 = vstv %s980_s16 }
 0x1b7   :  { %927 = vst.msk [vmem:[#allocation2] sm:$0x1] %vm926_vm6, %v925_v8 }
 0x1b8   :  { %942 = dma.vmem_to_hbm [thread:$0]  %s938_s15, 16, %s940_s13, [#allocation3]  }
 0x1bd   :  { %s982_s22 = spop %981 }
 0x1be   :  { %v930_v9 = vstv %s982_s22  ;;  %s984_s6 = spop %983 }
 0x1bf   :  { %931 = vst.msk [vmem:[#allocation6] sm:$0x1] %vm926_vm6, %v930_v9  ;;  %s924_s28 = ssub.f32 0.0, %s984_s6 }
 0x1c1   :  { %v928_v10 = vstv %s924_s28 }
 0x1c2   :  { %929 = vst.msk [vmem:[#allocation4] sm:$0x1] %vm926_vm6, %v928_v10 }
 0x1c3   :  { %953 = dma.vmem_to_hbm [thread:$0]  %s949_s18, 16, %s951_s21, [#allocation5]  }
 0x1c4   :  { %964 = dma.vmem_to_hbm [thread:$0]  %s960_s24, 16, %s962_s27, [#allocation5]  }
 0x1c5   :  { %1075 = dma.done.wait [#allocation3], 16  }
 0x1c6   :  { %1076 = vsyncadd [#allocation3], 4294967280 }
 0x1c7   :  { %1077 = dma.done.wait [#allocation5], 32  }
 0x1c8   :  { %1078 = vsyncadd [#allocation5], 4294967264 }
 0x1c9   :  { %977 = vsyncpa [#allocation3], 1 }
 0x1ca   :  { %978 = vsyncpa [#allocation5], 1 }

</bundles_post_ra>
